<compile_context>
chip_gen: v6e
topology: v6e:2x2x1
jax: 0.10.0
libtpu: 0.0.40
codegen_flags: <defaults>
</compile_context>

<pallas_src>
import functools

import jax
import jax.numpy as jnp
from jax.experimental import pallas as pl
from jax.experimental.pallas import tpu as pltpu

HIDDEN = 128
TB = 512  # default batch-tile rows (multiple of 8); clamped per-call below


def _round_up(n, m):
    return ((n + m - 1) // m) * m


def _policy_kernel(head_offsets, head_sizes, val_col,
                   x_ref, w1_ref, b1_ref, w2_ref, b2_ref,
                   wh_ref, bh_ref, out_ref):
    # fc1 + ReLU (normalization already folded into w1/b1), fc2 + ReLU.
    h1 = jnp.maximum(
        jnp.dot(x_ref[...], w1_ref[...], preferred_element_type=jnp.float32)
        + b1_ref[...], 0.0)
    h2 = jnp.maximum(
        jnp.dot(h1, w2_ref[...], preferred_element_type=jnp.float32)
        + b2_ref[...], 0.0)

    # All action heads + value head fused into one matmul: (tb, used).
    fused = jnp.dot(h2, wh_ref[...], preferred_element_type=jnp.float32) + bh_ref[...]

    tb, width = fused.shape
    col = jax.lax.broadcasted_iota(jnp.int32, (tb, width), 1)

    # Segmented softmax over the action-head columns (single exp over the slab).
    maxes = fused  # at non-head columns: exp(fused - fused) = 1, never overflows
    for off, sz in zip(head_offsets, head_sizes):
        in_head = (col >= off) & (col < off + sz)
        hm = jnp.max(jnp.where(in_head, fused, -jnp.inf), axis=-1, keepdims=True)
        maxes = jnp.where(in_head, hm, maxes)

    e = jnp.exp(fused - maxes)

    denom = jnp.ones_like(fused)
    for off, sz in zip(head_offsets, head_sizes):
        in_head = (col >= off) & (col < off + sz)
        hs = jnp.sum(jnp.where(in_head, e, 0.0), axis=-1, keepdims=True)
        denom = jnp.where(in_head, hs, denom)

    # EUP reciprocal + one Newton step keeps ~f32 accuracy (1e-5 tolerance).
    inv = pl.reciprocal(denom, approx=True)
    inv = inv * (2.0 - denom * inv)

    # Single whole-slab store: probabilities for head columns, raw value after.
    out_ref[...] = jnp.where(col < val_col, e * inv, fused)


def prepare_params(params, action_size_list):
    """One-time parameter prep (hoisted out of the forward hot loop)."""
    n_heads = len(action_size_list)

    inv_scale = (1.0 / params["norm_scale"]).astype(jnp.float32)
    center = params["norm_center"].astype(jnp.float32)
    w1 = params["w1"].astype(jnp.float32)
    b1 = params["b1"].astype(jnp.float32)

    # Fold (x - center) / scale into fc1:  relu(x @ w1' + b1') is identical.
    w1f = w1 * inv_scale[:, None]
    b1f = b1 - (center * inv_scale)[None, :] @ w1

    # Fuse all action heads + value head into one [HIDDEN, used] slab.
    wh = jnp.concatenate(
        [params[f"wh{i}"] for i in range(n_heads)] + [params["w4"]],
        axis=1).astype(jnp.float32)
    bh = jnp.concatenate(
        [params[f"bh{i}"] for i in range(n_heads)] + [params["b4"]],
        axis=1).astype(jnp.float32)

    return {
        "w1": w1f, "b1": b1f,
        "w2": params["w2"].astype(jnp.float32),
        "b2": params["b2"].astype(jnp.float32),
        "wh": wh, "bh": bh,
    }


def independent_policy_net_forward(x, prepped, action_size_list, *, tb=TB):
    """Pallas forward. x: [..., state_size]. Returns (list_of_probs, vals)."""
    state_size = x.shape[-1]
    lead_shape = x.shape[:-1]
    x2d = x.reshape(-1, state_size).astype(jnp.float32)
    B = x2d.shape[0]

    # Static head layout inside the fused output slab.
    head_offsets = []
    off = 0
    for a in action_size_list:
        head_offsets.append(off)
        off += a
    val_col = off
    used = val_col + 1  # + value head

    # Batch-tile selection: big tiles to amortize per-step overhead, clamped
    # for tiny batches; keep >= 2 grid steps for large single-tile batches so
    # the "parallel" axis can shard across both TensorCores on v7x.
    tb_eff = min(tb, _round_up(max(B, 1), 8))
    grid_b = pl.cdiv(B, tb_eff)
    if grid_b == 1 and B > 512:
        tb_eff = _round_up(pl.cdiv(B, 2), 8)
        grid_b = pl.cdiv(B, tb_eff)
    B_pad = grid_b * tb_eff
    if B_pad != B:
        x2d = jnp.pad(x2d, ((0, B_pad - B), (0, 0)))

    w1, b1 = prepped["w1"], prepped["b1"]
    w2, b2 = prepped["w2"], prepped["b2"]
    wh, bh = prepped["wh"], prepped["bh"]

    def resident(shape):
        nd = len(shape)
        return pl.BlockSpec(shape, lambda i, _nd=nd: (0,) * _nd)

    in_specs = [
        pl.BlockSpec((tb_eff, state_size), lambda i: (i, 0)),  # x: tiled rows
        resident(w1.shape), resident(b1.shape),
        resident(w2.shape), resident(b2.shape),
        resident(wh.shape), resident(bh.shape),
    ]
    out_specs = pl.BlockSpec((tb_eff, used), lambda i: (i, 0))
    out_shape = jax.ShapeDtypeStruct((B_pad, used), jnp.float32)

    flops = 2 * B_pad * (state_size * HIDDEN + HIDDEN * HIDDEN + HIDDEN * used)
    bytes_accessed = 4 * (B_pad * state_size + B_pad * used
                          + state_size * HIDDEN + HIDDEN * HIDDEN
                          + HIDDEN * used + 2 * HIDDEN + used)

    kernel = functools.partial(
        _policy_kernel, tuple(head_offsets), tuple(action_size_list), val_col)

    out = pl.pallas_call(
        kernel,
        out_shape=out_shape,
        grid=(grid_b,),
        in_specs=in_specs,
        out_specs=out_specs,
        compiler_params=pltpu.CompilerParams(
            dimension_semantics=("parallel",)),
        cost_estimate=pl.CostEstimate(
            flops=flops,
            transcendentals=2 * B_pad * used,
            bytes_accessed=bytes_accessed),
    )(x2d, w1, b1, w2, b2, wh, bh)

    probs = [
        out[:B, head_offsets[i]:head_offsets[i] + a].reshape(lead_shape + (a,))
        for i, a in enumerate(action_size_list)
    ]
    vals = out[:B, val_col:val_col + 1].reshape(lead_shape + (1,))
    return probs, vals


def init_params(key, state_size, action_size_list):
    """Deterministic PyTorch-Linear-style init; weights stored (in, out)."""
    params = {}
    keys = jax.random.split(key, 8 + 2 * len(action_size_list))

    def linear(kw, kb, fan_in, fan_out):
        bound = 1.0 / jnp.sqrt(fan_in)
        w = jax.random.uniform(kw, (fan_in, fan_out), jnp.float32, -bound, bound)
        b = jax.random.uniform(kb, (1, fan_out), jnp.float32, -bound, bound)
        return w, b

    params["w1"], params["b1"] = linear(keys[0], keys[1], state_size, HIDDEN)
    params["w2"], params["b2"] = linear(keys[2], keys[3], HIDDEN, HIDDEN)
    for i, a in enumerate(action_size_list):
        params[f"wh{i}"], params[f"bh{i}"] = linear(
            keys[4 + 2 * i], keys[5 + 2 * i], HIDDEN, a)
    k_off = 4 + 2 * len(action_size_list)
    params["w4"], params["b4"] = linear(keys[k_off], keys[k_off + 1], HIDDEN, 1)

    # Non-trivial norm constants (PyTorch default would be zeros/ones).
    params["norm_center"] = jnp.linspace(-0.5, 0.5, state_size, dtype=jnp.float32)
    params["norm_scale"] = jnp.linspace(0.5, 2.0, state_size, dtype=jnp.float32)
    return params


def reference_forward(x, params, action_size_list):
    """Pure-JAX reference for correctness check."""
    xs = (x - params["norm_center"]) / params["norm_scale"]
    h1 = jax.nn.relu(xs @ params["w1"] + params["b1"][0])
    h2 = jax.nn.relu(h1 @ params["w2"] + params["b2"][0])
    probs = [
        jax.nn.softmax(h2 @ params[f"wh{i}"] + params[f"bh{i}"][0], axis=-1)
        for i in range(len(action_size_list))
    ]
    vals = h2 @ params["w4"] + params["b4"][0]
    return probs, vals


if __name__ == "__main__":
    state_size = 32
    action_size_list = [3, 5, 7]

    key = jax.random.PRNGKey(0)
    k_params, k_x = jax.random.split(key)
    params = init_params(k_params, state_size, action_size_list)
    prepped = prepare_params(params, action_size_list)  # one-time prep

    # x has two leading batch dims like an agent/env batch: [2, 4, state_size]
    x = jax.random.normal(k_x, (2, 4, state_size), dtype=jnp.float32)

    probs, vals = independent_policy_net_forward(x, prepped, action_size_list)
    jax.block_until_ready(vals)
    for p in probs:
        jax.block_until_ready(p)

    ref_probs, ref_vals = reference_forward(x, params, action_size_list)
    ok = True
    for p, rp in zip(probs, ref_probs):
        ok = ok and bool(jnp.allclose(p, rp, atol=1e-5, rtol=1e-5))
        ok = ok and bool(jnp.allclose(jnp.sum(p, axis=-1), 1.0, atol=1e-5))
    ok = ok and bool(jnp.allclose(vals, ref_vals, atol=1e-5, rtol=1e-5))

    if ok:
        print("KERNEL_OK")
    else:
        print("MISMATCH")
</pallas_src>

<mosaic_0001>
module attributes {stable_mosaic.version = 11 : i64} {
  func.func @_policy_kernel(%arg0: i32, %arg1: memref<8x32xf32, #tpu.memory_space<vmem>>, %arg2: memref<32x128xf32, #tpu.memory_space<vmem>>, %arg3: memref<1x128xf32, #tpu.memory_space<vmem>>, %arg4: memref<128x128xf32, #tpu.memory_space<vmem>>, %arg5: memref<1x128xf32, #tpu.memory_space<vmem>>, %arg6: memref<128x16xf32, #tpu.memory_space<vmem>>, %arg7: memref<1x16xf32, #tpu.memory_space<vmem>>, %arg8: memref<8x16xf32, #tpu.memory_space<vmem>>) attributes {dimension_semantics = [#tpu.dimension_semantics<parallel>], iteration_bounds = array<i64: 1>, scalar_prefetch = 0 : i64, scratch_operands = 0 : i64, tpu.core_type = #tpu.core_type<tc>, window_params = [{transform_indices = @transform_0, window_bounds = array<i64: 8, 32>}, {pipeline_mode = #tpu.pipeline_mode<synchronous>, transform_indices = @transform_1, window_bounds = array<i64: 32, 128>}, {pipeline_mode = #tpu.pipeline_mode<synchronous>, transform_indices = @transform_2, window_bounds = array<i64: 1, 128>}, {pipeline_mode = #tpu.pipeline_mode<synchronous>, transform_indices = @transform_3, window_bounds = array<i64: 128, 128>}, {pipeline_mode = #tpu.pipeline_mode<synchronous>, transform_indices = @transform_4, window_bounds = array<i64: 1, 128>}, {pipeline_mode = #tpu.pipeline_mode<synchronous>, transform_indices = @transform_5, window_bounds = array<i64: 128, 16>}, {pipeline_mode = #tpu.pipeline_mode<synchronous>, transform_indices = @transform_6, window_bounds = array<i64: 1, 16>}, {transform_indices = @transform_7, window_bounds = array<i64: 8, 16>}]} {
    %c0 = arith.constant 0 : index
    %c0_0 = arith.constant 0 : index
    %0 = vector.load %arg1[%c0, %c0_0] : memref<8x32xf32, #tpu.memory_space<vmem>>, vector<8x32xf32>
    %c0_1 = arith.constant 0 : index
    %c0_2 = arith.constant 0 : index
    %1 = vector.load %arg2[%c0_1, %c0_2] : memref<32x128xf32, #tpu.memory_space<vmem>>, vector<32x128xf32>
    %cst = arith.constant dense<0.000000e+00> : vector<8x128xf32>
    %2 = tpu.matmul %0, %1, %cst {dimension_numbers = #tpu.dot_dimension_numbers<[1], [0], [0], [1], [0, 0, 1, 1], [], []>} : vector<8x32xf32>, vector<32x128xf32>, vector<8x128xf32> -> vector<8x128xf32>
    %c0_3 = arith.constant 0 : index
    %c0_4 = arith.constant 0 : index
    %3 = vector.load %arg3[%c0_3, %c0_4] : memref<1x128xf32, #tpu.memory_space<vmem>>, vector<1x128xf32>
    %4 = vector.broadcast %3 : vector<1x128xf32> to vector<8x128xf32>
    %5 = arith.addf %2, %4 : vector<8x128xf32>
    %cst_5 = arith.constant 0.000000e+00 : f32
    %6 = vector.broadcast %cst_5 : f32 to vector<8x128xf32>
    %7 = arith.maximumf %5, %6 : vector<8x128xf32>
    %c0_6 = arith.constant 0 : index
    %c0_7 = arith.constant 0 : index
    %8 = vector.load %arg4[%c0_6, %c0_7] : memref<128x128xf32, #tpu.memory_space<vmem>>, vector<128x128xf32>
    %cst_8 = arith.constant dense<0.000000e+00> : vector<8x128xf32>
    %9 = tpu.matmul %7, %8, %cst_8 {dimension_numbers = #tpu.dot_dimension_numbers<[1], [0], [0], [1], [0, 0, 1, 1], [], []>} : vector<8x128xf32>, vector<128x128xf32>, vector<8x128xf32> -> vector<8x128xf32>
    %c0_9 = arith.constant 0 : index
    %c0_10 = arith.constant 0 : index
    %10 = vector.load %arg5[%c0_9, %c0_10] : memref<1x128xf32, #tpu.memory_space<vmem>>, vector<1x128xf32>
    %11 = vector.broadcast %10 : vector<1x128xf32> to vector<8x128xf32>
    %12 = arith.addf %9, %11 : vector<8x128xf32>
    %cst_11 = arith.constant 0.000000e+00 : f32
    %13 = vector.broadcast %cst_11 : f32 to vector<8x128xf32>
    %14 = arith.maximumf %12, %13 : vector<8x128xf32>
    %c0_12 = arith.constant 0 : index
    %c0_13 = arith.constant 0 : index
    %15 = vector.load %arg6[%c0_12, %c0_13] : memref<128x16xf32, #tpu.memory_space<vmem>>, vector<128x16xf32>
    %cst_14 = arith.constant dense<0.000000e+00> : vector<8x16xf32>
    %16 = tpu.matmul %14, %15, %cst_14 {dimension_numbers = #tpu.dot_dimension_numbers<[1], [0], [0], [1], [0, 0, 1, 1], [], []>} : vector<8x128xf32>, vector<128x16xf32>, vector<8x16xf32> -> vector<8x16xf32>
    %c0_15 = arith.constant 0 : index
    %c0_16 = arith.constant 0 : index
    %17 = vector.load %arg7[%c0_15, %c0_16] : memref<1x16xf32, #tpu.memory_space<vmem>>, vector<1x16xf32>
    %18 = vector.broadcast %17 : vector<1x16xf32> to vector<8x16xf32>
    %19 = arith.addf %16, %18 : vector<8x16xf32>
    %20 = tpu.iota {dimensions = array<i32: 1>} : vector<8x16xi32>
    %c0_i32 = arith.constant 0 : i32
    %21 = vector.broadcast %c0_i32 : i32 to vector<8x16xi32>
    %22 = arith.cmpi sge, %20, %21 : vector<8x16xi32>
    %c3_i32 = arith.constant 3 : i32
    %23 = vector.broadcast %c3_i32 : i32 to vector<8x16xi32>
    %24 = arith.cmpi slt, %20, %23 : vector<8x16xi32>
    %25 = arith.andi %22, %24 : vector<8x16xi1>
    %cst_17 = arith.constant 0xFF800000 : f32
    %26 = vector.broadcast %cst_17 : f32 to vector<8x16xf32>
    %27 = arith.select %25, %19, %26 : vector<8x16xi1>, vector<8x16xf32>
    %cst_18 = arith.constant dense<0xFF800000> : vector<8xf32>
    %28 = vector.multi_reduction <maximumf>, %27, %cst_18 [1] : vector<8x16xf32> to vector<8xf32>
    %29 = vector.shape_cast %28 : vector<8xf32> to vector<8x1xf32>
    %30 = vector.shape_cast %29 : vector<8x1xf32> to vector<8x1xf32>
    %31 = vector.broadcast %30 : vector<8x1xf32> to vector<8x16xf32>
    %32 = arith.select %25, %31, %19 : vector<8x16xi1>, vector<8x16xf32>
    %c3_i32_19 = arith.constant 3 : i32
    %33 = vector.broadcast %c3_i32_19 : i32 to vector<8x16xi32>
    %34 = arith.cmpi sge, %20, %33 : vector<8x16xi32>
    %c8_i32 = arith.constant 8 : i32
    %35 = vector.broadcast %c8_i32 : i32 to vector<8x16xi32>
    %36 = arith.cmpi slt, %20, %35 : vector<8x16xi32>
    %37 = arith.andi %34, %36 : vector<8x16xi1>
    %cst_20 = arith.constant 0xFF800000 : f32
    %38 = vector.broadcast %cst_20 : f32 to vector<8x16xf32>
    %39 = arith.select %37, %19, %38 : vector<8x16xi1>, vector<8x16xf32>
    %cst_21 = arith.constant dense<0xFF800000> : vector<8xf32>
    %40 = vector.multi_reduction <maximumf>, %39, %cst_21 [1] : vector<8x16xf32> to vector<8xf32>
    %41 = vector.shape_cast %40 : vector<8xf32> to vector<8x1xf32>
    %42 = vector.shape_cast %41 : vector<8x1xf32> to vector<8x1xf32>
    %43 = vector.broadcast %42 : vector<8x1xf32> to vector<8x16xf32>
    %44 = arith.select %37, %43, %32 : vector<8x16xi1>, vector<8x16xf32>
    %c8_i32_22 = arith.constant 8 : i32
    %45 = vector.broadcast %c8_i32_22 : i32 to vector<8x16xi32>
    %46 = arith.cmpi sge, %20, %45 : vector<8x16xi32>
    %c15_i32 = arith.constant 15 : i32
    %47 = vector.broadcast %c15_i32 : i32 to vector<8x16xi32>
    %48 = arith.cmpi slt, %20, %47 : vector<8x16xi32>
    %49 = arith.andi %46, %48 : vector<8x16xi1>
    %cst_23 = arith.constant 0xFF800000 : f32
    %50 = vector.broadcast %cst_23 : f32 to vector<8x16xf32>
    %51 = arith.select %49, %19, %50 : vector<8x16xi1>, vector<8x16xf32>
    %cst_24 = arith.constant dense<0xFF800000> : vector<8xf32>
    %52 = vector.multi_reduction <maximumf>, %51, %cst_24 [1] : vector<8x16xf32> to vector<8xf32>
    %53 = vector.shape_cast %52 : vector<8xf32> to vector<8x1xf32>
    %54 = vector.shape_cast %53 : vector<8x1xf32> to vector<8x1xf32>
    %55 = vector.broadcast %54 : vector<8x1xf32> to vector<8x16xf32>
    %56 = arith.select %49, %55, %44 : vector<8x16xi1>, vector<8x16xf32>
    %57 = arith.subf %19, %56 : vector<8x16xf32>
    %58 = math.exp %57 : vector<8x16xf32>
    %cst_25 = arith.constant 1.000000e+00 : f32
    %59 = vector.broadcast %cst_25 : f32 to vector<8x16xf32>
    %c0_i32_26 = arith.constant 0 : i32
    %60 = vector.broadcast %c0_i32_26 : i32 to vector<8x16xi32>
    %61 = arith.cmpi sge, %20, %60 : vector<8x16xi32>
    %c3_i32_27 = arith.constant 3 : i32
    %62 = vector.broadcast %c3_i32_27 : i32 to vector<8x16xi32>
    %63 = arith.cmpi slt, %20, %62 : vector<8x16xi32>
    %64 = arith.andi %61, %63 : vector<8x16xi1>
    %cst_28 = arith.constant 0.000000e+00 : f32
    %65 = vector.broadcast %cst_28 : f32 to vector<8x16xf32>
    %66 = arith.select %64, %58, %65 : vector<8x16xi1>, vector<8x16xf32>
    %cst_29 = arith.constant dense<0.000000e+00> : vector<8xf32>
    %67 = vector.multi_reduction <add>, %66, %cst_29 [1] : vector<8x16xf32> to vector<8xf32>
    %68 = vector.shape_cast %67 : vector<8xf32> to vector<8x1xf32>
    %69 = vector.shape_cast %68 : vector<8x1xf32> to vector<8x1xf32>
    %70 = vector.broadcast %69 : vector<8x1xf32> to vector<8x16xf32>
    %71 = arith.select %64, %70, %59 : vector<8x16xi1>, vector<8x16xf32>
    %c3_i32_30 = arith.constant 3 : i32
    %72 = vector.broadcast %c3_i32_30 : i32 to vector<8x16xi32>
    %73 = arith.cmpi sge, %20, %72 : vector<8x16xi32>
    %c8_i32_31 = arith.constant 8 : i32
    %74 = vector.broadcast %c8_i32_31 : i32 to vector<8x16xi32>
    %75 = arith.cmpi slt, %20, %74 : vector<8x16xi32>
    %76 = arith.andi %73, %75 : vector<8x16xi1>
    %cst_32 = arith.constant 0.000000e+00 : f32
    %77 = vector.broadcast %cst_32 : f32 to vector<8x16xf32>
    %78 = arith.select %76, %58, %77 : vector<8x16xi1>, vector<8x16xf32>
    %cst_33 = arith.constant dense<0.000000e+00> : vector<8xf32>
    %79 = vector.multi_reduction <add>, %78, %cst_33 [1] : vector<8x16xf32> to vector<8xf32>
    %80 = vector.shape_cast %79 : vector<8xf32> to vector<8x1xf32>
    %81 = vector.shape_cast %80 : vector<8x1xf32> to vector<8x1xf32>
    %82 = vector.broadcast %81 : vector<8x1xf32> to vector<8x16xf32>
    %83 = arith.select %76, %82, %71 : vector<8x16xi1>, vector<8x16xf32>
    %c8_i32_34 = arith.constant 8 : i32
    %84 = vector.broadcast %c8_i32_34 : i32 to vector<8x16xi32>
    %85 = arith.cmpi sge, %20, %84 : vector<8x16xi32>
    %c15_i32_35 = arith.constant 15 : i32
    %86 = vector.broadcast %c15_i32_35 : i32 to vector<8x16xi32>
    %87 = arith.cmpi slt, %20, %86 : vector<8x16xi32>
    %88 = arith.andi %85, %87 : vector<8x16xi1>
    %cst_36 = arith.constant 0.000000e+00 : f32
    %89 = vector.broadcast %cst_36 : f32 to vector<8x16xf32>
    %90 = arith.select %88, %58, %89 : vector<8x16xi1>, vector<8x16xf32>
    %cst_37 = arith.constant dense<0.000000e+00> : vector<8xf32>
    %91 = vector.multi_reduction <add>, %90, %cst_37 [1] : vector<8x16xf32> to vector<8xf32>
    %92 = vector.shape_cast %91 : vector<8xf32> to vector<8x1xf32>
    %93 = vector.shape_cast %92 : vector<8x1xf32> to vector<8x1xf32>
    %94 = vector.broadcast %93 : vector<8x1xf32> to vector<8x16xf32>
    %95 = arith.select %88, %94, %83 : vector<8x16xi1>, vector<8x16xf32>
    %96 = tpu.reciprocal %95 {approx = true} : vector<8x16xf32> -> vector<8x16xf32>
    %97 = arith.mulf %95, %96 : vector<8x16xf32>
    %cst_38 = arith.constant 2.000000e+00 : f32
    %98 = vector.broadcast %cst_38 : f32 to vector<8x16xf32>
    %99 = arith.subf %98, %97 : vector<8x16xf32>
    %100 = arith.mulf %96, %99 : vector<8x16xf32>
    %c15_i32_39 = arith.constant 15 : i32
    %101 = vector.broadcast %c15_i32_39 : i32 to vector<8x16xi32>
    %102 = arith.cmpi slt, %20, %101 : vector<8x16xi32>
    %103 = arith.mulf %58, %100 : vector<8x16xf32>
    %104 = arith.select %102, %103, %19 : vector<8x16xi1>, vector<8x16xf32>
    %c0_40 = arith.constant 0 : index
    %c0_41 = arith.constant 0 : index
    %105 = vector.load %arg8[%c0_40, %c0_41] : memref<8x16xf32, #tpu.memory_space<vmem>>, vector<8x16xf32>
    tpu.vector_store %arg8[%c0_40, %c0_41], %104 {strides = array<i32>} : memref<8x16xf32, #tpu.memory_space<vmem>>, vector<8x16xf32>,
    return
  }
  func.func @transform_0(%arg0: i32) -> (i32, i32) {
    %c0_i32 = arith.constant 0 : i32
    %c0_i32_0 = arith.constant 0 : i32
    return %arg0, %c0_i32 : i32, i32
  }
  func.func @transform_1(%arg0: i32) -> (i32, i32) {
    %c0_i32 = arith.constant 0 : i32
    %c0_i32_0 = arith.constant 0 : i32
    %c0_i32_1 = arith.constant 0 : i32
    return %c0_i32, %c0_i32_0 : i32, i32
  }
  func.func @transform_2(%arg0: i32) -> (i32, i32) {
    %c0_i32 = arith.constant 0 : i32
    %c0_i32_0 = arith.constant 0 : i32
    %c0_i32_1 = arith.constant 0 : i32
    return %c0_i32, %c0_i32_0 : i32, i32
  }
  func.func @transform_3(%arg0: i32) -> (i32, i32) {
    %c0_i32 = arith.constant 0 : i32
    %c0_i32_0 = arith.constant 0 : i32
    %c0_i32_1 = arith.constant 0 : i32
    return %c0_i32, %c0_i32_0 : i32, i32
  }
  func.func @transform_4(%arg0: i32) -> (i32, i32) {
    %c0_i32 = arith.constant 0 : i32
    %c0_i32_0 = arith.constant 0 : i32
    %c0_i32_1 = arith.constant 0 : i32
    return %c0_i32, %c0_i32_0 : i32, i32
  }
  func.func @transform_5(%arg0: i32) -> (i32, i32) {
    %c0_i32 = arith.constant 0 : i32
    %c0_i32_0 = arith.constant 0 : i32
    %c0_i32_1 = arith.constant 0 : i32
    return %c0_i32, %c0_i32_0 : i32, i32
  }
  func.func @transform_6(%arg0: i32) -> (i32, i32) {
    %c0_i32 = arith.constant 0 : i32
    %c0_i32_0 = arith.constant 0 : i32
    %c0_i32_1 = arith.constant 0 : i32
    return %c0_i32, %c0_i32_0 : i32, i32
  }
  func.func @transform_7(%arg0: i32) -> (i32, i32) {
    %c0_i32 = arith.constant 0 : i32
    %c0_i32_0 = arith.constant 0 : i32
    return %arg0, %c0_i32 : i32, i32
  }
}

</mosaic_0001>

<bundles_post_ra>
// kernel: tpu_custom_call.1
= control target key start
LH: loop header
LB: loop body
LE: loop exit
PB: predicated region body
PF: predicated region fallthrough
CT: control target
= control target key end

     0   :  { %12 = vsyncpa [#allocation3], 0  ;;  %s799_s0 = inlined_call_operand.vmem [shape: f32[8,32], index: 0, kind: input, shape index: {}]   ;;  %s800_s1 = inlined_call_operand.hbm [shape: f32[32,128], index: 1, kind: input, shape index: {}]   ;;  %s801_s2 = inlined_call_operand.vmem [shape: f32[1,128], index: 2, kind: input, shape index: {}]   ;;  %s802_s3 = inlined_call_operand.vmem [shape: f32[128,128], index: 3, kind: input, shape index: {}]   ;;  %s803_s4 = inlined_call_operand.vmem [shape: f32[1,128], index: 4, kind: input, shape index: {}]   ;;  %s804_s5 = inlined_call_operand.vmem [shape: f32[128,16], index: 5, kind: input, shape index: {}]   ;;  %s805_s6 = inlined_call_operand.vmem [shape: f32[1,16], index: 6, kind: input, shape index: {}]   ;;  %s806_s7 = inlined_call_operand.hbm [shape: f32[8,16], index: 7, kind: output, shape index: {}]  }
   0x1   :  { %13 = vsyncpa [#allocation4], 0  ;;  %s560_s24 = smov [#allocation2]  }
   0x2   :  { %s21_s25 = sshll.u32 %s560_s24, 4  ;;  %s22_s25 = int_to_ptr.vmem [resolvable:$true] %s21_s25 }
   0x3   :  { %s524_s26 = scalar_lea.vmem %s22_s25, 512  ;;  %p529_p1 = scmp.lt.s32.totalorder %s22_s25, %s22_s25 }
   0x4   :  { %p525_p0 = scmp.ne.s32.totalorder %s22_s25, %s524_s26  ;;  %p530_p2 = scmp.lt.s32.totalorder %s524_s26, %s524_s26 }
   0x6   :  { %p531_p3 = por %p530_p2, %p529_p1 }
   0x8   :  { %p532_p4 = pnand %p531_p3, %p525_p0 }
   0xa   :  { %535 = shalt.err (!%p532_p4)
}
   0xb   :  { %s561_s27 = smov 128   ;;  %s562_s28 = smov 8  }
   0xc   :  { %27 = dma.hbm_to_vmem [thread:$0]  %s800_s1, 512, %s22_s25, [#allocation3], %s561_s27, %s561_s27, %s562_s28  }
   0xd   :  { %556 = dma.done.wait [#allocation3], 512  }
   0xe   :  { %557 = vsyncadd [#allocation3], 4294966784  ;;  %v563_v0 = vmov 0.0   ;;  %vm564_vm0 = vmmov 0   ;;  %v45_v1 = vld [vmem:[#allocation2 + $0x18] sm:$0xff]  ;;  %v44_v2 = vld [vmem:[#allocation2 + $0x10] sm:$0xff]  ;;  %v315_v48 = vlaneseq }
   0xf   :  { %425 = vmatprep.subr.mxu0 %v563_v0  ;;  %433 = vmatprep.mubr.msk.f32.mxu0 %vm564_vm0, %v563_v0  ;;  %v143_v3 = vld [vmem:[%s802_s3 + $0x78] sm:$0xff]  ;;  %v43_v4 = vld [vmem:[#allocation2 + $0x8] sm:$0xff]  ;;  %v142_v5 = vld [vmem:[%s802_s3 + $0x70] sm:$0xff]  ;;  %vm53_vm1 = vcmask 261120   ;;  %vm321_vm8 = vcmask 130048  }
  0x10   :  { %436 = vmatprep.subr.mxu1 %v563_v0  ;;  %468 = vmatprep.mubr.msk.f32.mxu1 %vm564_vm0, %v563_v0  ;;  %v141_v6 = vld [vmem:[%s802_s3 + $0x68] sm:$0xff]  ;;  %v42_v7 = vld [vmem:[#allocation2] sm:$0xff]  ;;  %v139_v10 = vld [vmem:[%s802_s3 + $0x58] sm:$0xff]  ;;  %v316_v49 = vand.u32 127, %v315_v48 }
  0x11   :  { %426 = vmatpush3.msra.mxu0 %v45_v1  ;;  %437 = vmatpush3.msra.mxu1 %v143_v3  ;;  %v41_v8 = vld [vmem:[%s799_s0] sm:$0xff]  ;;  %v138_v11 = vld [vmem:[%s802_s3 + $0x50] sm:$0xff]  ;;  %v137_v12 = vld [vmem:[%s802_s3 + $0x48] sm:$0xff] }
  0x12   :  { %427 = vmatprep.subr.mxu0 %v563_v0  ;;  %438 = vmatprep.subr.mxu1 %v563_v0  ;;  %v140_v9 = vld [vmem:[%s802_s3 + $0x60] sm:$0xff]  ;;  %v135_v14 = vld [vmem:[%s802_s3 + $0x38] sm:$0xff]  ;;  %v134_v15 = vld [vmem:[%s802_s3 + $0x30] sm:$0xff]  ;;  %vm334_vm2 = vcmp.ge.s32.totalorder %v316_v49, 8  ;;  %vm335_vm3 = vcmp.lt.s32.totalorder %v316_v49, 15  ;;  %vm326_vm4 = vcmp.ge.s32.totalorder %v316_v49, 3 }
  0x13   :  { %428 = vmatpush3.msra.mxu0 %v44_v2  ;;  %439 = vmatpush3.msra.mxu1 %v142_v5  ;;  %v136_v13 = vld [vmem:[%s802_s3 + $0x40] sm:$0xff]  ;;  %v133_v16 = vld [vmem:[%s802_s3 + $0x28] sm:$0xff]  ;;  %v131_v18 = vld [vmem:[%s802_s3 + $0x18] sm:$0xff]  ;;  %vm327_vm5 = vcmp.lt.s32.totalorder %v316_v49, 8  ;;  %vm318_vm7 = vcmp.lt.s32.totalorder %v316_v49, 3 }
  0x14   :  { %429 = vmatprep.subr.mxu0 %v563_v0  ;;  %440 = vmatprep.subr.mxu1 %v563_v0  ;;  %v132_v17 = vld [vmem:[%s802_s3 + $0x20] sm:$0xff]  ;;  %v130_v19 = vld [vmem:[%s802_s3 + $0x10] sm:$0xff]  ;;  %v129_v20 = vld [vmem:[%s802_s3 + $0x8] sm:$0xff] }
  0x15   :  { %430 = vmatpush3.msra.mxu0 %v43_v4  ;;  %441 = vmatpush3.msra.mxu1 %v141_v6  ;;  %v128_v21 = vld [vmem:[%s802_s3] sm:$0xff]  ;;  %v237_v22 = vld [vmem:[%s804_s5 + $0x78] sm:$0xff]  ;;  %v236_v23 = vld [vmem:[%s804_s5 + $0x70] sm:$0xff] }
  0x16   :  { %431 = vmatprep.subr.mxu0 %v563_v0  ;;  %442 = vmatprep.subr.mxu1 %v563_v0  ;;  %v235_v24 = vld [vmem:[%s804_s5 + $0x68] sm:$0xff]  ;;  %v234_v25 = vld [vmem:[%s804_s5 + $0x60] sm:$0xff]  ;;  %v233_v26 = vld [vmem:[%s804_s5 + $0x58] sm:$0xff] }
  0x17   :  { %432 = vmatpush3.msra.mxu0 %v42_v7  ;;  %443 = vmatpush3.msra.mxu1 %v140_v9  ;;  %v232_v27 = vld [vmem:[%s804_s5 + $0x50] sm:$0xff]  ;;  %v231_v28 = vld [vmem:[%s804_s5 + $0x48] sm:$0xff]  ;;  %v230_v29 = vld [vmem:[%s804_s5 + $0x40] sm:$0xff] }
  0x18   :  { %434 = vmatmul.mubr.msk.f32.vlgmr.msra.gmra.mxu0 %vm53_vm1, %v41_v8  ;;  %444 = vmatprep.subr.mxu1 %v563_v0  ;;  %v229_v30 = vld [vmem:[%s804_s5 + $0x38] sm:$0xff]  ;;  %v228_v31 = vld [vmem:[%s804_s5 + $0x30] sm:$0xff]  ;;  %v227_v32 = vld [vmem:[%s804_s5 + $0x28] sm:$0xff] }
  0x19   :  { %471 = vmatprep.subr.mxu0 %v563_v0  ;;  %445 = vmatpush3.msra.mxu1 %v139_v10  ;;  %v226_v33 = vld [vmem:[%s804_s5 + $0x20] sm:$0xff]  ;;  %v225_v34 = vld [vmem:[%s804_s5 + $0x18] sm:$0xff]  ;;  %v224_v40 = vld [vmem:[%s804_s5 + $0x10] sm:$0xff] }
  0x1a   :  { %503 = vmatprep.mubr.msk.f32.mxu0 %vm564_vm0, %v563_v0  ;;  %446 = vmatprep.subr.mxu1 %v563_v0  ;;  %v382_v35 = vld [vmem:[%s801_s2] ss:$0 sm:$0xff]  ;;  %v223_v41 = vld [vmem:[%s804_s5 + $0x8] sm:$0xff]  ;;  %vm760_vm6 = vmand %vm334_vm2, %vm335_vm3 }
  0x1b   :  { %447 = vmatpush3.msra.mxu1 %v138_v11  ;;  %472 = vmatpush3.msra.mxu0 %v237_v22  ;;  %v222_v42 = vld [vmem:[%s804_s5] sm:$0xff]  ;;  %vm764_vm9 = vmand %vm326_vm4, %vm327_vm5 }
  0x1c   :  { %448 = vmatprep.subr.mxu1 %v563_v0  ;;  %473 = vmatprep.subr.mxu0 %v563_v0  ;;  %v384_v43 = vld [vmem:[%s803_s4] ss:$0 sm:$0xff]  ;;  %s565_s4 = smov [#allocation5]  }
  0x1d   :  { %449 = vmatpush3.msra.mxu1 %v137_v12  ;;  %474 = vmatpush3.msra.mxu0 %v236_v23  ;;  %v385_v50 = vld [vmem:[%s805_s6] ss:$0 sm:$0xff]  ;;  %s373_s5 = sshll.u32 %s565_s4, 4  ;;  %s374_s5 = int_to_ptr.vmem [resolvable:$true] %s373_s5 }
  0x1e   :  { %450 = vmatprep.subr.mxu1 %v563_v0  ;;  %475 = vmatprep.subr.mxu0 %v563_v0  ;;  %s536_s6 = scalar_lea.vmem %s374_s5, 128  ;;  %p541_p6 = scmp.lt.s32.totalorder %s374_s5, %s374_s5 }
  0x1f   :  { %451 = vmatpush3.msra.mxu1 %v136_v13  ;;  %476 = vmatpush3.msra.mxu0 %v235_v24  ;;  %p537_p5 = scmp.ne.s32.totalorder %s374_s5, %s536_s6  ;;  %p542_p7 = scmp.lt.s32.totalorder %s536_s6, %s536_s6 }
  0x20   :  { %452 = vmatprep.subr.mxu1 %v563_v0  ;;  %477 = vmatprep.subr.mxu0 %v563_v0 }
  0x21   :  { %453 = vmatpush3.msra.mxu1 %v135_v14  ;;  %478 = vmatpush3.msra.mxu0 %v234_v25  ;;  %p543_p8 = por %p542_p7, %p541_p6 }
  0x22   :  { %454 = vmatprep.subr.mxu1 %v563_v0  ;;  %479 = vmatprep.subr.mxu0 %v563_v0 }
  0x23   :  { %455 = vmatpush3.msra.mxu1 %v134_v15  ;;  %480 = vmatpush3.msra.mxu0 %v233_v26  ;;  %p544_p9 = pnand %p543_p8, %p537_p5 }
  0x24   :  { %456 = vmatprep.subr.mxu1 %v563_v0  ;;  %481 = vmatprep.subr.mxu0 %v563_v0 }
  0x25   :  { %457 = vmatpush3.msra.mxu1 %v133_v16  ;;  %482 = vmatpush3.msra.mxu0 %v232_v27 }
  0x26   :  { %458 = vmatprep.subr.mxu1 %v563_v0  ;;  %483 = vmatprep.subr.mxu0 %v563_v0 }
  0x27   :  { %459 = vmatpush3.msra.mxu1 %v132_v17  ;;  %484 = vmatpush3.msra.mxu0 %v231_v28 }
  0x28   :  { %460 = vmatprep.subr.mxu1 %v563_v0  ;;  %485 = vmatprep.subr.mxu0 %v563_v0 }
  0x29   :  { %461 = vmatpush3.msra.mxu1 %v131_v18  ;;  %486 = vmatpush3.msra.mxu0 %v230_v29 }
  0x2a   :  { %462 = vmatprep.subr.mxu1 %v563_v0  ;;  %487 = vmatprep.subr.mxu0 %v563_v0 }
  0x2b   :  { %463 = vmatpush3.msra.mxu1 %v130_v19  ;;  %488 = vmatpush3.msra.mxu0 %v229_v30 }
  0x2c   :  { %464 = vmatprep.subr.mxu1 %v563_v0  ;;  %489 = vmatprep.subr.mxu0 %v563_v0 }
  0x2d   :  { %465 = vmatpush3.msra.mxu1 %v129_v20  ;;  %490 = vmatpush3.msra.mxu0 %v228_v31 }
  0x2e   :  { %466 = vmatprep.subr.mxu1 %v563_v0  ;;  %491 = vmatprep.subr.mxu0 %v563_v0 }
  0x2f   :  { %467 = vmatpush3.msra.mxu1 %v128_v21  ;;  %492 = vmatpush3.msra.mxu0 %v227_v32 }
  0x30   :  { %493 = vmatprep.subr.mxu0 %v563_v0 }
  0x31   :  { %494 = vmatpush3.msra.mxu0 %v226_v33 }
  0x32   :  { %495 = vmatprep.subr.mxu0 %v563_v0 }
  0x33   :  { %496 = vmatpush3.msra.mxu0 %v225_v34 }
  0x34   :  { %497 = vmatprep.subr.mxu0 %v563_v0 }
  0x35   :  { %498 = vmatpush3.msra.mxu0 %v224_v40 }
  0x36   :  { %499 = vmatprep.subr.mxu0 %v563_v0 }
  0x37   :  { %500 = vmatpush3.msra.mxu0 %v223_v41 }
  0x38   :  { %501 = vmatprep.subr.mxu0 %v563_v0 }
  0x39   :  { %502 = vmatpush3.msra.mxu0 %v222_v42 }
  0xd8   :  { %v123_v36 = vpop.f32.mrf.mxu0 }
  0xd9   :  { %v124_v37 = vadd.f32 %v382_v35, %v123_v36 }
  0xda   :  { %v435_v38 = vpop.f32.mrf.mxu0 }
  0xdb   :  { %v127_v39 = vmax.f32 %v124_v37, 0.0 }
  0xdd   :  { %469 = vmatmul.mubr.f32.vlgmr.msra.gmra.mxu1 %v127_v39 }
 0x19d   :  { %v217_v44 = vpop.f32.mrf.mxu1 }
 0x19e   :  { %v218_v45 = vadd.f32 %v384_v43, %v217_v44 }
 0x19f   :  { %v470_v46 = vpop.f32.mrf.mxu1 }
 0x1a0   :  { %v221_v47 = vmax.f32 %v218_v45, 0.0 }
 0x1a2   :  { %504 = vmatmul.mubr.f32.vlgmr.msra.gmra.mxu0 %v221_v47 }
 0x262   :  { %v311_v51 = vpop.f32.mrf.mxu0 }
 0x263   :  { %v312_v53 = vadd.f32 %v385_v50, %v311_v51 }
 0x264   :  { %v505_v54 = vpop.f32.mrf.mxu0 }
 0x265   :  { %v337_v56 = vsel %vm760_vm6, %v312_v53, -inf  ;;  %v320_v57 = vsel %vm318_vm7, %v312_v53, -inf  ;;  %v329_v60 = vsel %vm764_vm9, %v312_v53, -inf }
 0x266   :  { %v338_v58 = vsel %vm321_vm8, %v337_v56, -inf  ;;  %v322_v59 = vsel %vm321_vm8, %v320_v57, -inf  ;;  %v330_v61 = vsel %vm321_vm8, %v329_v60, -inf }
 0x267   :  { %339 = vmax.xlane.f32.xlu1 %v338_v58  ;;  %323 = vmax.xlane.f32.xlu0 %v322_v59 }
 0x26b   :  { %331 = vmax.xlane.f32.xlu0 %v330_v61 }
 0x2f0   :  { %v324_v62 = vpop.xlane.xlu0 %323  ;;  %v340_v1 = vpop.xlane.xlu1 %339 }
 0x2f1   :  { %v325_v63 = vsel %vm318_vm7, %v324_v62, %v312_v53 }
 0x2f4   :  { %v332_v0 = vpop.xlane.xlu0 %331 }
 0x2f5   :  { %v333_v2 = vsel %vm764_vm9, %v332_v0, %v325_v63 }
 0x2f6   :  { %v341_v3 = vsel %vm760_vm6, %v340_v1, %v333_v2 }
 0x2f7   :  { %v342_v4 = vsub.f32 %v312_v53, %v341_v3 }
 0x2f9   :  { %v343_v5 = vmul.f32 1.442695, %v342_v4 }
 0x2fb   :  { %512 = vpow2.f32 %v343_v5 }
 0x308   :  { %v513_v6 = vpop.eup %512 }
 0x309   :  { %v350_v7 = vsel %vm764_vm9, %v513_v6, 0.0  ;;  %v345_v8 = vsel %vm318_vm7, %v513_v6, 0.0  ;;  %v355_v11 = vsel %vm760_vm6, %v513_v6, 0.0 }
 0x30a   :  { %v351_v9 = vsel %vm321_vm8, %v350_v7, 0.0  ;;  %v346_v10 = vsel %vm321_vm8, %v345_v8, 0.0  ;;  %v356_v12 = vsel %vm321_vm8, %v355_v11, 0.0 }
 0x30b   :  { %352 = vadd.xlane.f32.xlu0 %v351_v9  ;;  %347 = vadd.xlane.f32.xlu1 %v346_v10 }
 0x30f   :  { %357 = vadd.xlane.f32.xlu1 %v356_v12 }
 0x394   :  { %v348_v13 = vpop.xlane.xlu1 %347  ;;  %v353_v14 = vpop.xlane.xlu0 %352 }
 0x395   :  { %v349_v15 = vsel %vm318_vm7, %v348_v13, 1.0 }
 0x396   :  { %v354_v16 = vsel %vm764_vm9, %v353_v14, %v349_v15 }
 0x398   :  { %v358_v17 = vpop.xlane.xlu1 %357 }
 0x399   :  { %v359_v18 = vsel %vm760_vm6, %v358_v17, %v354_v16 }
 0x39a   :  { %514 = vrcp.f32 %v359_v18 }
 0x3a7   :  { %v515_v19 = vpop.eup %514 }
 0x3a8   :  { %v361_v20 = vmul.f32 %v515_v19, %v359_v18 }
 0x3aa   :  { %v362_v21 = vsub.f32 2.0, %v361_v20 }
 0x3ac   :  { %v363_v22 = vmul.f32 %v515_v19, %v362_v21 }
 0x3ae   :  { %v364_v23 = vmul.f32 %v513_v6, %v363_v22 }
 0x3b0   :  { %v365_v24 = vsel %vm335_vm3, %v364_v23, %v312_v53 }
 0x3b1   :  { %366 = vst.msk [vmem:[#allocation5] sm:$0xff] %vm321_vm8, %v365_v24 }
 0x3b2   :  { %547 = shalt.err (!%p544_p9)
}
 0x3b3   :  { %376 = dma.vmem_to_hbm [thread:$0]  %s374_s5, 128, %s806_s7, [#allocation4]  }
 0x3b4   :  { %558 = dma.done.wait [#allocation4], 128  }
 0x3b5   :  { %559 = vsyncadd [#allocation4], 4294967168 }
 0x3b6   :  { %380 = vsyncpa [#allocation3], 1 }
 0x3b7   :  { %381 = vsyncpa [#allocation4], 1 }

</bundles_post_ra>
